<compile_context>
chip_gen: v5e
topology: v5e:2x2
jax: 0.10.0
libtpu: 0.0.40
codegen_flags: <defaults>
</compile_context>

<pallas_src>
import numpy as np
import jax
import jax.numpy as jnp
from jax.experimental import pallas as pl
from jax.experimental.pallas import tpu as pltpu

# ----------------------------- model dimensions (small, consistent with CombinedModel) ----
SENT_DIM = 128            # sent_dim == in_channels of GNN == NHEAD * OUT_CH
FF_DIM = 128              # ff_dim
NHEAD = 4                 # nhead
OUT_CH = SENT_DIM // NHEAD
EDGE_DIM = 128            # edge_dim
NUM_LAYER = 2             # num_layer
NUM_CLASS = 7             # num_class
EDGE_START_DIM = 64       # edge_starting_dim
ROBERTA_HIDDEN = 1024     # UtteranceEncoder.hidden_dim (roberta-large)
LN_EPS = 1e-5

assert SENT_DIM == NHEAD * OUT_CH, "in_channels must equal heads * out_channels"


# ----------------------------- shared small math ------------------------------------------
def _layernorm(x, g, b):
    mu = jnp.mean(x, axis=-1, keepdims=True)
    var = jnp.mean(jnp.square(x - mu), axis=-1, keepdims=True)
    return (x - mu) * jax.lax.rsqrt(var + LN_EPS) * g + b


def _clamp_vmem(est_bytes):
    # Raise above the 16/32 MiB scoped defaults, but never past v7x's 64 MiB physical VMEM.
    return int(min(max(est_bytes, 32 * 1024 * 1024), 64 * 1024 * 1024))


# ----------------------------- kernel 1: utterance encoder pool + mapping -----------------
def _encoder_pool_kernel(h_ref, w_ref, b_ref, o_ref, pool_ref):
    # UtteranceEncoder: running max over the sequence axis (grid axis 1), then Linear mapping.
    s = pl.program_id(1)

    @pl.when(s == 0)
    def _():
        pool_ref[...] = jnp.full(pool_ref.shape, -jnp.inf, pool_ref.dtype)

    pool_ref[...] = jnp.maximum(pool_ref[...], jnp.max(h_ref[...], axis=1))

    @pl.when(s == pl.num_programs(1) - 1)
    def _():
        o_ref[...] = (
            jnp.dot(pool_ref[...].astype(jnp.bfloat16), w_ref[...],
                    preferred_element_type=jnp.float32)
            + b_ref[...]
        )


def _enc_tiles(n_pad, seq, budget_bytes=24 * 1024 * 1024):
    """Node tile up to 256 rows; seq tile chosen so 2 double-buffered f32 blocks fit VMEM."""
    tile_n = min(256, n_pad)                         # n_pad is a multiple of 8
    per_seq = 2 * tile_n * ROBERTA_HIDDEN * 4        # bytes per seq element (double-buffered f32)
    max_seq_tile = max(8, budget_bytes // per_seq)
    if seq <= max_seq_tile:
        return tile_n, seq
    cand = (max_seq_tile // 8) * 8
    while cand >= 8:
        if seq % cand == 0:
            return tile_n, cand
        cand -= 8
    return tile_n, seq  # TODO(synk): seq not a multiple of 8 -> fall back to a single seq block


def _enc_vmem_limit(tile_n, seq_tile):
    est = (2 * tile_n * seq_tile * ROBERTA_HIDDEN * 4      # double-buffered input block (f32)
           + tile_n * ROBERTA_HIDDEN * 4                   # pool accumulator scratch
           + 2 * ROBERTA_HIDDEN * SENT_DIM * 2             # mapping weight (bf16)
           + 2 * tile_n * SENT_DIM * 4                     # output block
           + (1 << 20))
    return _clamp_vmem(est)


def utterance_encode(hidden, w_bf16, b_f32, n_pad):
    n, seq, dh = hidden.shape
    tile_n, seq_tile = _enc_tiles(n_pad, seq)
    grid = (pl.cdiv(n_pad, tile_n), pl.cdiv(seq, seq_tile))
    return pl.pallas_call(
        _encoder_pool_kernel,
        grid=grid,
        out_shape=jax.ShapeDtypeStruct((n_pad, SENT_DIM), jnp.float32),
        in_specs=[
            pl.BlockSpec((tile_n, seq_tile, dh), lambda i, s: (i, s, 0)),
            pl.BlockSpec((dh, SENT_DIM), lambda i, s: (0, 0)),
            pl.BlockSpec((1, SENT_DIM), lambda i, s: (0, 0)),
        ],
        out_specs=pl.BlockSpec((tile_n, SENT_DIM), lambda i, s: (i, 0)),
        scratch_shapes=[pltpu.VMEM((tile_n, dh), jnp.float32)],
        compiler_params=pltpu.CompilerParams(
            dimension_semantics=("parallel", "arbitrary"),
            vmem_limit_bytes=_enc_vmem_limit(tile_n, seq_tile)),
    )(hidden, w_bf16, b_f32)


# ----------------------------- kernel 2: one TransformerConv + FFN layer, dst-tiled -------
def _gnn_layer_kernel(
    xfull_ref, xtile_ref, adj_ref, eraw_ref,
    wq_ref, bq_ref, wk_ref, bk_ref, wv_ref, bv_ref, ws_ref, bs_ref,
    wef_ref, bef_ref, wbeta_ref,
    ln1g_ref, ln1b_ref, ffw1_ref, ffb1_ref, ffw2_ref, ffb2_ref,
    ln2g_ref, ln2b_ref, o_ref,
):
    t = xtile_ref.shape[0]      # dst-tile rows
    n = xfull_ref.shape[0]      # all src nodes (padded)
    scale = jnp.float32(1.0 / np.sqrt(OUT_CH))

    xf_bf = xfull_ref[...].astype(jnp.bfloat16)
    xt_bf = xtile_ref[...].astype(jnp.bfloat16)

    # Projections (MXU, bf16 inputs / f32 accumulation).  k, v need every src node;
    # q and the skip projection only need the dst tile.
    k = jnp.dot(xf_bf, wk_ref[...], preferred_element_type=jnp.float32) + bk_ref[...]
    v = jnp.dot(xf_bf, wv_ref[...], preferred_element_type=jnp.float32) + bv_ref[...]
    q = jnp.dot(xt_bf, wq_ref[...], preferred_element_type=jnp.float32) + bq_ref[...]
    xr = jnp.dot(xt_bf, ws_ref[...], preferred_element_type=jnp.float32) + bs_ref[...]

    # Edge features for this dst tile: GNNWrapper.mapping and the (bias-free) per-layer lin_edge
    # are pre-folded into a single [64 -> 128] matmul; the edge tensor is kept in bf16.
    e = (jnp.dot(eraw_ref[...].astype(jnp.bfloat16), wef_ref[...],
                 preferred_element_type=jnp.float32) + bef_ref[...])
    e_bf = e.astype(jnp.bfloat16).reshape(t, n, SENT_DIM)

    # All-head attention logits, lane-dense: one full-128-lane VPU multiply q*(k+e) followed by
    # a block-diagonal head-selector matmul (MXU) that sums each head's 32 lanes and re-broadcasts
    # them, producing replicated-head logits [T, N, 128] without any 32-lane slices or head loop.
    ri = jax.lax.broadcasted_iota(jnp.int32, (SENT_DIM, SENT_DIM), 0) // OUT_CH
    ci = jax.lax.broadcasted_iota(jnp.int32, (SENT_DIM, SENT_DIM), 1) // OUT_CH
    hsel = (ri == ci).astype(jnp.bfloat16)                                   # [128, 128] 0/1

    contrib = (q[:, None, :] * (k[None, :, :] + e_bf)).astype(jnp.bfloat16)  # [T, N, 128]
    logits = jnp.dot(contrib.reshape(t * n, SENT_DIM), hsel,
                     preferred_element_type=jnp.float32).reshape(t, n, SENT_DIM) * scale

    adj3 = adj_ref[...][:, :, None]                                          # [T, N, 1]
    logits = jnp.where(adj3 > 0.0, logits, jnp.float32(-1e30))
    m = jnp.max(logits, axis=1, keepdims=True)                               # softmax over src
    p = jnp.exp(logits - m) * adj3
    denom = jnp.sum(p, axis=1, keepdims=True)
    attn = p * pl.reciprocal(jnp.maximum(denom, jnp.float32(1e-20)), approx=True)

    # Message aggregation: one full-lane multiply + sublane (src) reduce.
    out = jnp.sum(attn * (v[None, :, :] + e_bf), axis=1)                     # [T, 128]

    # beta gate: lane-dense VPU mul + lane reduce (no [T, 384] concat, no 1-wide matmul)
    wb = wbeta_ref[...]                                                      # [3, 128]
    beta = jax.nn.sigmoid(jnp.sum(
        out * wb[0:1, :] + xr * wb[1:2, :] + (out - xr) * wb[2:3, :],
        axis=-1, keepdims=True))
    x = beta * xr + (1.0 - beta) * out

    # FeedForward2Layer: LN -> Linear -> ReLU -> Linear -> residual -> LN (dropout = identity)
    ss = _layernorm(x, ln1g_ref[...], ln1b_ref[...])
    hid = jnp.maximum(
        jnp.dot(ss.astype(jnp.bfloat16), ffw1_ref[...],
                preferred_element_type=jnp.float32) + ffb1_ref[...], 0.0)
    ss2 = jnp.dot(hid.astype(jnp.bfloat16), ffw2_ref[...],
                  preferred_element_type=jnp.float32) + ffb2_ref[...]
    o_ref[...] = _layernorm(ss + ss2, ln2g_ref[...], ln2b_ref[...])


def _gnn_vmem_limit(tile_dst, n_pad):
    tn = tile_dst * n_pad
    est = (2 * tn * EDGE_START_DIM * 4        # double-buffered raw-edge tile (f32)
           + 2 * tn * 4                       # double-buffered adj tile
           + 2 * n_pad * SENT_DIM * 4         # full x (resident)
           + 8 * tn * SENT_DIM * 4            # ~8 live f32 [T, N, 128]-sized temporaries
           + 24 * SENT_DIM * SENT_DIM * 4     # layer weights (generous)
           + (2 << 20))
    return _clamp_vmem(est)


def gnn_layer(x, adj, e_raw_flat, lw, tile_dst, vmem_limit):
    n_pad = x.shape[0]
    args = [
        x, x, adj, e_raw_flat,
        lw["wq"], lw["bq"], lw["wk"], lw["bk"], lw["wv"], lw["bv"], lw["ws"], lw["bs"],
        lw["wef"], lw["bef"], lw["wbeta"],
        lw["ln1g"], lw["ln1b"], lw["ffw1"], lw["ffb1"], lw["ffw2"], lw["ffb2"],
        lw["ln2g"], lw["ln2b"],
    ]
    in_specs = [
        pl.BlockSpec((n_pad, SENT_DIM), lambda i: (0, 0)),                    # x (all src nodes)
        pl.BlockSpec((tile_dst, SENT_DIM), lambda i: (i, 0)),                 # x (dst tile)
        pl.BlockSpec((tile_dst, n_pad), lambda i: (i, 0)),                    # adj rows
        pl.BlockSpec((tile_dst * n_pad, EDGE_START_DIM), lambda i: (i, 0)),   # raw edge rows
    ] + [pl.BlockSpec(w.shape, lambda i: (0, 0)) for w in args[4:]]
    return pl.pallas_call(
        _gnn_layer_kernel,
        grid=(pl.cdiv(n_pad, tile_dst),),
        out_shape=jax.ShapeDtypeStruct((n_pad, SENT_DIM), jnp.float32),
        in_specs=in_specs,
        out_specs=pl.BlockSpec((tile_dst, SENT_DIM), lambda i: (i, 0)),
        compiler_params=pltpu.CompilerParams(
            dimension_semantics=("parallel",),
            vmem_limit_bytes=vmem_limit),
    )(*args)


# ----------------------------- kernel 3: classifier (lane-dense 128-wide output) ----------
def _linear_kernel(x_ref, w_ref, b_ref, o_ref):
    o_ref[...] = (
        jnp.dot(x_ref[...].astype(jnp.bfloat16), w_ref[...],
                preferred_element_type=jnp.float32) + b_ref[...]
    )


def classifier(x, w_bf16, b_f32):
    n_pad, d = x.shape
    tile = min(256, n_pad)
    return pl.pallas_call(
        _linear_kernel,
        grid=(pl.cdiv(n_pad, tile),),
        out_shape=jax.ShapeDtypeStruct((n_pad, w_bf16.shape[1]), jnp.float32),
        in_specs=[
            pl.BlockSpec((tile, d), lambda i: (i, 0)),
            pl.BlockSpec(w_bf16.shape, lambda i: (0, 0)),
            pl.BlockSpec(b_f32.shape, lambda i: (0, 0)),
        ],
        out_specs=pl.BlockSpec((tile, w_bf16.shape[1]), lambda i: (i, 0)),
        compiler_params=pltpu.CompilerParams(dimension_semantics=("parallel",)),
    )(x, w_bf16, b_f32)


# ----------------------------- parameters --------------------------------------------------
def init_params(key):
    keys = list(jax.random.split(key, 128))
    it = iter(keys)

    def lin(in_d, out_d, bias=True):
        w = 0.5 * jax.random.normal(next(it), (in_d, out_d), jnp.float32) / np.sqrt(in_d)
        b = (0.02 * jax.random.normal(next(it), (out_d,), jnp.float32)
             if bias else jnp.zeros((out_d,), jnp.float32))
        return w, b

    params = {
        "enc_map": lin(ROBERTA_HIDDEN, SENT_DIM),        # UtteranceEncoder.mapping
        "edge_map": lin(EDGE_START_DIM, EDGE_DIM),       # GNNWrapper.mapping
        "cls": lin(SENT_DIM, NUM_CLASS),                 # classifier
        "layers": [],
    }
    for _ in range(NUM_LAYER):
        lp = {
            "q": lin(SENT_DIM, SENT_DIM),
            "k": lin(SENT_DIM, SENT_DIM),
            "v": lin(SENT_DIM, SENT_DIM),
            "skip": lin(SENT_DIM, SENT_DIM),
            "edge": lin(EDGE_DIM, SENT_DIM, bias=False),       # lin_edge (bias=False)
            "beta": lin(3 * SENT_DIM, 1, bias=False),          # lin_beta (bias=False)
            "ln1_g": 1.0 + 0.05 * jax.random.normal(next(it), (SENT_DIM,), jnp.float32),
            "ln1_b": 0.05 * jax.random.normal(next(it), (SENT_DIM,), jnp.float32),
            "ln2_g": 1.0 + 0.05 * jax.random.normal(next(it), (SENT_DIM,), jnp.float32),
            "ln2_b": 0.05 * jax.random.normal(next(it), (SENT_DIM,), jnp.float32),
        }
        lp["ff_w1"], lp["ff_b1"] = lin(SENT_DIM, FF_DIM)
        lp["ff_w2"], lp["ff_b2"] = lin(FF_DIM, SENT_DIM)
        params["layers"].append(lp)
    return params


def pack_params(params):
    """Cast matmul weights to bf16, fold mapping+lin_edge per layer, pad classifier to 128 lanes."""
    bf = lambda a: jnp.asarray(a, jnp.bfloat16)
    f32 = lambda a: jnp.asarray(a, jnp.float32)
    wmap, bmap = params["edge_map"]

    layers = []
    for lp in params["layers"]:
        we = lp["edge"][0]                                   # [EDGE_DIM, SENT_DIM], bias-free
        layers.append(dict(
            wq=bf(lp["q"][0]), bq=f32(lp["q"][1].reshape(1, -1)),
            wk=bf(lp["k"][0]), bk=f32(lp["k"][1].reshape(1, -1)),
            wv=bf(lp["v"][0]), bv=f32(lp["v"][1].reshape(1, -1)),
            ws=bf(lp["skip"][0]), bs=f32(lp["skip"][1].reshape(1, -1)),
            wef=bf(wmap @ we),                               # mapping folded into lin_edge
            bef=f32((bmap.reshape(1, -1) @ we)),
            wbeta=f32(lp["beta"][0][:, 0].reshape(3, SENT_DIM)),
            ln1g=f32(lp["ln1_g"].reshape(1, -1)), ln1b=f32(lp["ln1_b"].reshape(1, -1)),
            ffw1=bf(lp["ff_w1"]), ffb1=f32(lp["ff_b1"].reshape(1, -1)),
            ffw2=bf(lp["ff_w2"]), ffb2=f32(lp["ff_b2"].reshape(1, -1)),
            ln2g=f32(lp["ln2_g"].reshape(1, -1)), ln2b=f32(lp["ln2_b"].reshape(1, -1)),
        ))

    wcls = jnp.zeros((SENT_DIM, SENT_DIM), jnp.float32).at[:, :NUM_CLASS].set(params["cls"][0])
    bcls = jnp.zeros((1, SENT_DIM), jnp.float32).at[0, :NUM_CLASS].set(params["cls"][1])
    return dict(
        enc_w=bf(params["enc_map"][0]), enc_b=f32(params["enc_map"][1].reshape(1, -1)),
        layers=layers, wcls=bf(wcls), bcls=bcls,
    )


# ----------------------------- forward (glue + pallas kernels) ----------------------------
def _build_edge_index(conv_len, edge_indices_local):
    # mirrors CombinedModel.forward batching of per-conversation graphs
    cum = []
    count = 0
    for i, l in enumerate(conv_len):
        num_edge = int(edge_indices_local[i].shape[1])
        cum += [count] * num_edge
        count += l
    cum = np.asarray([cum, cum], dtype=np.int32)
    edge_index = np.concatenate(edge_indices_local, axis=1).astype(np.int32) + cum
    return edge_index  # [2, E_total]


def combined_forward(packed, hidden_states, conv_len, edge_indices_local, edge_attrs):
    n = hidden_states.shape[0]
    n_pad = ((n + 7) // 8) * 8    # pad nodes to the sublane multiple; padded nodes have no edges

    # --- UtteranceEncoder: max-pool over seq + Linear(1024 -> sent_dim), tiled over (nodes, seq)
    sent_emb = utterance_encode(hidden_states, packed["enc_w"], packed["enc_b"], n_pad)
    # zero out padded rows (their partial-tile reads are undefined); keeps everything finite
    sent_emb = jnp.where(jnp.arange(n_pad)[:, None] < n, sent_emb, 0.0)

    # --- batch graphs (host glue, mirrors CombinedModel.forward) and densify ---
    edge_index = _build_edge_index(conv_len, edge_indices_local)
    src = jnp.asarray(edge_index[0])
    dst = jnp.asarray(edge_index[1])
    ea_raw = jnp.concatenate([jnp.asarray(e, jnp.float32) for e in edge_attrs], axis=0)
    adj = jnp.zeros((n_pad, n_pad), jnp.float32).at[dst, src].set(1.0)
    e_raw = jnp.zeros((n_pad, n_pad, EDGE_START_DIM), jnp.float32).at[dst, src].set(ea_raw)
    e_raw_flat = e_raw.reshape(n_pad * n_pad, EDGE_START_DIM)   # row = dst * n_pad + src

    # --- GNN layers, each a dst-tiled pallas_call (liveness bounded per layer) ---
    tile_dst = min(128, n_pad)
    vmem_limit = _gnn_vmem_limit(tile_dst, n_pad)
    x = sent_emb
    for lw in packed["layers"]:
        x = gnn_layer(x, adj, e_raw_flat, lw, tile_dst, vmem_limit)

    # --- classifier, lane-dense [n_pad, 128] output sliced to 7 classes in JAX ---
    logits_pad = classifier(x, packed["wcls"], packed["bcls"])
    return logits_pad[:n, :NUM_CLASS]


# ----------------------------- pure-JAX reference (sparse/segment formulation, f32) --------
def reference_forward(params, hidden_states, conv_len, edge_indices_local, edge_attrs):
    with jax.default_matmul_precision("highest"):
        sent_emb = jnp.max(hidden_states, axis=1) @ params["enc_map"][0] + params["enc_map"][1]
        n = hidden_states.shape[0]
        edge_index = _build_edge_index(conv_len, edge_indices_local)
        src = jnp.asarray(edge_index[0])
        dst = jnp.asarray(edge_index[1])
        ea = jnp.concatenate([jnp.asarray(e, jnp.float32) for e in edge_attrs], axis=0)
        ea = ea @ params["edge_map"][0] + params["edge_map"][1]
        x = sent_emb
        for lp in params["layers"]:
            e = (ea @ lp["edge"][0]).reshape(-1, NHEAD, OUT_CH)
            q = (x @ lp["q"][0] + lp["q"][1]).reshape(n, NHEAD, OUT_CH)
            k = (x @ lp["k"][0] + lp["k"][1]).reshape(n, NHEAD, OUT_CH)
            v = (x @ lp["v"][0] + lp["v"][1]).reshape(n, NHEAD, OUT_CH)
            alpha = jnp.sum(q[dst] * (k[src] + e), axis=-1) / np.sqrt(OUT_CH)     # [E, H]
            amax = jax.ops.segment_max(alpha, dst, num_segments=n)
            p = jnp.exp(alpha - amax[dst])
            denom = jax.ops.segment_sum(p, dst, num_segments=n)
            attn = p / denom[dst]
            msg = (v[src] + e) * attn[:, :, None]
            out = jax.ops.segment_sum(msg, dst, num_segments=n).reshape(n, SENT_DIM)
            xr = x @ lp["skip"][0] + lp["skip"][1]
            beta = jax.nn.sigmoid(
                jnp.concatenate([out, xr, out - xr], axis=-1) @ lp["beta"][0])
            x = beta * xr + (1.0 - beta) * out
            ss = _layernorm(x, lp["ln1_g"], lp["ln1_b"])
            h = jax.nn.relu(ss @ lp["ff_w1"] + lp["ff_b1"])
            x = _layernorm(ss + h @ lp["ff_w2"] + lp["ff_b2"], lp["ln2_g"], lp["ln2_b"])
        return x @ params["cls"][0] + params["cls"][1]


# ----------------------------- main --------------------------------------------------------
if __name__ == "__main__":
    key = jax.random.PRNGKey(0)
    k_param, k_hidden, k_e0, k_e1 = jax.random.split(key, 4)

    params = init_params(k_param)
    packed = pack_params(params)

    # two conversations: 3 and 4 utterances -> N = 7 graph nodes, seq len 8
    conv_len = [3, 4]
    n_utt = sum(conv_len)
    seq_len = 8
    hidden_states = jax.random.normal(k_hidden, (n_utt, seq_len, ROBERTA_HIDDEN), jnp.float32)

    # per-conversation local edge indices [2, E_i] (src row 0, dst row 1) and edge attrs
    edge_indices_local = [
        np.array([[0, 1, 2, 0], [1, 2, 0, 2]], dtype=np.int32),
        np.array([[0, 1, 2, 3, 0], [1, 2, 3, 0, 2]], dtype=np.int32),
    ]
    edge_attrs = [
        jax.random.normal(k_e0, (4, EDGE_START_DIM), jnp.float32),
        jax.random.normal(k_e1, (5, EDGE_START_DIM), jnp.float32),
    ]

    logits = combined_forward(packed, hidden_states, conv_len, edge_indices_local, edge_attrs)
    logits = jax.block_until_ready(logits)
    assert logits.shape == (n_utt, NUM_CLASS)
    assert bool(jnp.all(jnp.isfinite(logits)))

    ref = jax.block_until_ready(
        reference_forward(params, hidden_states, conv_len, edge_indices_local, edge_attrs)
    )
    # Kernel uses bf16 MXU inputs (f32 accumulation); reference runs at f32-highest precision.
    np.testing.assert_allclose(np.asarray(logits), np.asarray(ref), rtol=5e-2, atol=5e-2)

    print("KERNEL_OK")
</pallas_src>

<mosaic_0001>
module attributes {stable_mosaic.version = 11 : i64} {
  func.func @_encoder_pool_kernel(%arg0: i32, %arg1: i32, %arg2: memref<8x8x1024xf32, #tpu.memory_space<vmem>>, %arg3: memref<1024x128xbf16, #tpu.memory_space<vmem>>, %arg4: memref<1x128xf32, #tpu.memory_space<vmem>>, %arg5: memref<8x128xf32, #tpu.memory_space<vmem>>, %arg6: memref<8x1024xf32, #tpu.memory_space<vmem>>) attributes {dimension_semantics = [#tpu.dimension_semantics<parallel>, #tpu.dimension_semantics<arbitrary>], iteration_bounds = array<i64: 1, 1>, scalar_prefetch = 0 : i64, scratch_operands = 1 : i64, tpu.core_type = #tpu.core_type<tc>, window_params = [{transform_indices = @transform_0, window_bounds = array<i64: 8, 8, 1024>}, {pipeline_mode = #tpu.pipeline_mode<synchronous>, transform_indices = @transform_1, window_bounds = array<i64: 1024, 128>}, {pipeline_mode = #tpu.pipeline_mode<synchronous>, transform_indices = @transform_2, window_bounds = array<i64: 1, 128>}, {transform_indices = @transform_3, window_bounds = array<i64: 8, 128>}]} {
    %c0_i32 = arith.constant 0 : i32
    %0 = arith.cmpi eq, %arg1, %c0_i32 : i32
    %1 = arith.extui %0 : i1 to i32
    %c0_i32_0 = arith.constant 0 : i32
    %2 = arith.cmpi ne, %1, %c0_i32_0 : i32
    scf.if %2 {
      %cst_9 = arith.constant 0xFF800000 : f32
      %11 = vector.broadcast %cst_9 : f32 to vector<8x1024xf32>
      %c0_10 = arith.constant 0 : index
      %c0_11 = arith.constant 0 : index
      %12 = vector.load %arg6[%c0_10, %c0_11] : memref<8x1024xf32, #tpu.memory_space<vmem>>, vector<8x1024xf32>
      tpu.vector_store %arg6[%c0_10, %c0_11], %11 {strides = array<i32>} : memref<8x1024xf32, #tpu.memory_space<vmem>>, vector<8x1024xf32>,
    } else {
    }
    %c0 = arith.constant 0 : index
    %c0_1 = arith.constant 0 : index
    %3 = vector.load %arg6[%c0, %c0_1] : memref<8x1024xf32, #tpu.memory_space<vmem>>, vector<8x1024xf32>
    %c0_2 = arith.constant 0 : index
    %c0_3 = arith.constant 0 : index
    %c0_4 = arith.constant 0 : index
    %4 = vector.load %arg2[%c0_2, %c0_3, %c0_4] : memref<8x8x1024xf32, #tpu.memory_space<vmem>>, vector<8x8x1024xf32>
    %cst = arith.constant dense<0xFF800000> : vector<8x1024xf32>
    %5 = vector.multi_reduction <maximumf>, %4, %cst [1] : vector<8x8x1024xf32> to vector<8x1024xf32>
    %6 = arith.maximumf %3, %5 : vector<8x1024xf32>
    %c0_5 = arith.constant 0 : index
    %c0_6 = arith.constant 0 : index
    %7 = vector.load %arg6[%c0_5, %c0_6] : memref<8x1024xf32, #tpu.memory_space<vmem>>, vector<8x1024xf32>
    tpu.vector_store %arg6[%c0_5, %c0_6], %6 {strides = array<i32>} : memref<8x1024xf32, #tpu.memory_space<vmem>>, vector<8x1024xf32>,
    %c0_i32_7 = arith.constant 0 : i32
    %8 = arith.cmpi eq, %arg1, %c0_i32_7 : i32
    %9 = arith.extui %8 : i1 to i32
    %c0_i32_8 = arith.constant 0 : i32
    %10 = arith.cmpi ne, %9, %c0_i32_8 : i32
    scf.if %10 {
      %c0_9 = arith.constant 0 : index
      %c0_10 = arith.constant 0 : index
      %11 = vector.load %arg6[%c0_9, %c0_10] : memref<8x1024xf32, #tpu.memory_space<vmem>>, vector<8x1024xf32>
      %12 = arith.truncf %11 : vector<8x1024xf32> to vector<8x1024xbf16>
      %c0_11 = arith.constant 0 : index
      %c0_12 = arith.constant 0 : index
      %13 = vector.load %arg3[%c0_11, %c0_12] : memref<1024x128xbf16, #tpu.memory_space<vmem>>, vector<1024x128xbf16>
      %cst_13 = arith.constant dense<0.000000e+00> : vector<8x128xf32>
      %14 = tpu.matmul %12, %13, %cst_13 {dimension_numbers = #tpu.dot_dimension_numbers<[1], [0], [0], [1], [0, 0, 1, 1], [], []>} : vector<8x1024xbf16>, vector<1024x128xbf16>, vector<8x128xf32> -> vector<8x128xf32>
      %c0_14 = arith.constant 0 : index
      %c0_15 = arith.constant 0 : index
      %15 = vector.load %arg4[%c0_14, %c0_15] : memref<1x128xf32, #tpu.memory_space<vmem>>, vector<1x128xf32>
      %16 = vector.broadcast %15 : vector<1x128xf32> to vector<8x128xf32>
      %17 = arith.addf %14, %16 : vector<8x128xf32>
      %c0_16 = arith.constant 0 : index
      %c0_17 = arith.constant 0 : index
      %18 = vector.load %arg5[%c0_16, %c0_17] : memref<8x128xf32, #tpu.memory_space<vmem>>, vector<8x128xf32>
      tpu.vector_store %arg5[%c0_16, %c0_17], %17 {strides = array<i32>} : memref<8x128xf32, #tpu.memory_space<vmem>>, vector<8x128xf32>,
    } else {
    }
    return
  }
  func.func @transform_0(%arg0: i32, %arg1: i32) -> (i32, i32, i32) {
    %c0_i32 = arith.constant 0 : i32
    %c0_i32_0 = arith.constant 0 : i32
    return %arg0, %arg1, %c0_i32 : i32, i32, i32
  }
  func.func @transform_1(%arg0: i32, %arg1: i32) -> (i32, i32) {
    %c0_i32 = arith.constant 0 : i32
    %c0_i32_0 = arith.constant 0 : i32
    %c0_i32_1 = arith.constant 0 : i32
    return %c0_i32, %c0_i32_0 : i32, i32
  }
  func.func @transform_2(%arg0: i32, %arg1: i32) -> (i32, i32) {
    %c0_i32 = arith.constant 0 : i32
    %c0_i32_0 = arith.constant 0 : i32
    %c0_i32_1 = arith.constant 0 : i32
    return %c0_i32, %c0_i32_0 : i32, i32
  }
  func.func @transform_3(%arg0: i32, %arg1: i32) -> (i32, i32) {
    %c0_i32 = arith.constant 0 : i32
    %c0_i32_0 = arith.constant 0 : i32
    return %arg0, %c0_i32 : i32, i32
  }
}

</mosaic_0001>

<bundles_post_ra>
// kernel: tpu_custom_call.1
= control target key start
LH: loop header
LB: loop body
LE: loop exit
PB: predicated region body
PF: predicated region fallthrough
CT: control target
= control target key end

     0   :  { %8 = vsyncpa [#allocation4], 0  ;;  %s1823_s0 = inlined_call_operand.hbm [shape: f32[7,8,1024], index: 0, kind: input, shape index: {}]   ;;  %s1824_s1 = inlined_call_operand.hbm [shape: bf16[1024,128], index: 1, kind: input, shape index: {}]   ;;  %s1825_s2 = inlined_call_operand.vmem [shape: f32[1,128], index: 2, kind: input, shape index: {}]   ;;  %s1826_s3 = inlined_call_operand.hbm [shape: f32[8,128], index: 3, kind: output, shape index: {}]  }
   0x1   :  { %9 = vsyncpa [#allocation7], 0 }
   0x2   :  { %10 = vsyncpa [#allocation5], 0 }
   0x3   :  { %14 = vsyncadd [#allocation4], 1024  ;;  %s15_s14 = sshll.u32 %s1823_s0, 4  ;;  %s1729_s15 = smov [#allocation3]   ;;  %s16_s14 = int_to_ptr.hbm [resolvable:$true] %s15_s14 }
   0x4   :  { %s17_s16 = sshll.u32 %s1729_s15, 4  ;;  %s28_s19 = sshll.u32 %s1824_s1, 4  ;;  %s18_s16 = int_to_ptr.vmem [resolvable:$true] %s17_s16  ;;  %s29_s19 = int_to_ptr.hbm [resolvable:$true] %s28_s19 }
   0x5   :  { %s1730_s20 = smov 1024   ;;  %s1731_s21 = smov 64  }
   0x6   :  { %23 = dma.hbm_to_vmem [thread:$0]  %s16_s14, 7168, %s18_s16, [#allocation4], %s1730_s20, %s1730_s20, %s1731_s21  }
   0x7   :  { %s1732_s22 = smov [#allocation6]   ;;  %s1733_s24 = smov 4  }
   0x8   :  { %s30_s23 = sshll.u32 %s1732_s22, 4  ;;  %s31_s23 = int_to_ptr.vmem [resolvable:$true] %s30_s23 }
   0x9   :  { %36 = dma.hbm_to_vmem [thread:$0]  %s29_s19, 8192, %s31_s23, [#allocation7], %s1731_s21, %s1731_s21, %s1733_s24  }
   0xa   :  { %1723 = dma.done.wait [#allocation4], 8192  }
   0xb   :  { %1724 = vsyncadd [#allocation4], 4294959104 }
   0xc   :  { %1725 = dma.done.wait [#allocation7], 8192  }
   0xd   :  { %1726 = vsyncadd [#allocation7], 4294959104  ;;  %v1587_v0 = vld [vmem:[#allocation6 + $0x38] sm:$0xff]  ;;  %v1586_v4 = vld [vmem:[#allocation6 + $0x30] sm:$0xff]  ;;  %vm579_vm0 = vcmask 1041409   ;;  %vm581_vm1 = vcmask 1042434  }
   0xe   :  { %v1595_v1 = vld [vmem:[#allocation6 + $0x78] sm:$0xff]  ;;  %1201 = vmatpush.bf16.msra.mxu0 %v1587_v0  ;;  %v1594_v5 = vld [vmem:[#allocation6 + $0x70] sm:$0xff]  ;;  %v1585_v8 = vld [vmem:[#allocation6 + $0x28] sm:$0xff]  ;;  %vm583_vm2 = vcmask 1043459   ;;  %vm585_vm3 = vcmask 1044484   ;;  %vm587_vm4 = vcmask 1045509  }
   0xf   :  { %v1603_v2 = vld [vmem:[#allocation6 + $0xb8] sm:$0xff]  ;;  %1214 = vmatpush.bf16.msra.mxu1 %v1595_v1  ;;  %v1602_v6 = vld [vmem:[#allocation6 + $0xb0] sm:$0xff]  ;;  %v1593_v9 = vld [vmem:[#allocation6 + $0x68] sm:$0xff]  ;;  %vm589_vm5 = vcmask 1046534   ;;  %vm591_vm6 = vcmask 1047559   ;;  %s1734_s25 = smov [#allocation8]  }
  0x10   :  { %v1611_v3 = vld [vmem:[#allocation6 + $0xf8] sm:$0xff]  ;;  %1227 = vmatpush.bf16.msra.mxu2 %v1603_v2  ;;  %v1610_v7 = vld [vmem:[#allocation6 + $0xf0] sm:$0xff]  ;;  %v1601_v10 = vld [vmem:[#allocation6 + $0xa8] sm:$0xff]  ;;  %s1311_s26 = sshll.u32 %s1734_s25, 4  ;;  %s1313_s28 = sshll.u32 %s1826_s3, 4  ;;  %s1312_s26 = int_to_ptr.vmem [resolvable:$true] %s1311_s26  ;;  %s1314_s28 = int_to_ptr.hbm [resolvable:$true] %s1313_s28 }
  0x11   :  { %1240 = vmatpush.bf16.msra.mxu3 %v1611_v3  ;;  %v1609_v11 = vld [vmem:[#allocation6 + $0xe8] sm:$0xff]  ;;  %v1584_v12 = vld [vmem:[#allocation6 + $0x20] sm:$0xff]  ;;  %v1583_v16 = vld [vmem:[#allocation6 + $0x18] sm:$0xff] }
  0x12   :  { %1202 = vmatpush.bf16.msra.mxu0 %v1586_v4  ;;  %v1592_v13 = vld [vmem:[#allocation6 + $0x60] sm:$0xff]  ;;  %v1591_v17 = vld [vmem:[#allocation6 + $0x58] sm:$0xff]  ;;  %v69_v20 = vld [vmem:[#allocation3 + $0x10] sm:$0xff] }
  0x13   :  { %1215 = vmatpush.bf16.msra.mxu1 %v1594_v5  ;;  %v1600_v14 = vld [vmem:[#allocation6 + $0xa0] sm:$0xff]  ;;  %v1599_v18 = vld [vmem:[#allocation6 + $0x98] sm:$0xff]  ;;  %v77_v21 = vld [vmem:[#allocation3 + $0x50] sm:$0xff]  ;;  %v143_v25 = vrot.slane %v69_v20, 4 }
  0x14   :  { %1228 = vmatpush.bf16.msra.mxu2 %v1602_v6  ;;  %v1608_v15 = vld [vmem:[#allocation6 + $0xe0] sm:$0xff]  ;;  %v1607_v19 = vld [vmem:[#allocation6 + $0xd8] sm:$0xff]  ;;  %v85_v22 = vld [vmem:[#allocation3 + $0x90] sm:$0xff]  ;;  %v191_v26 = vrot.slane %v77_v21, 4 }
  0x15   :  { %1241 = vmatpush.bf16.msra.mxu3 %v1610_v7  ;;  %v93_v23 = vld [vmem:[#allocation3 + $0xd0] sm:$0xff]  ;;  %v239_v30 = vrot.slane %v85_v22, 4  ;;  %v144_v33 = vmax.f32 %v69_v20, %v143_v25  ;;  %v1581_v61 = vld [vmem:[#allocation6 + $0x8] sm:$0xff]  ;;  %v94_v20 = vld [vmem:[#allocation3 + $0xd8] sm:$0xff] }
  0x16   :  { %1203 = vmatpush.bf16.msra.mxu0 %v1585_v8  ;;  %v101_v24 = vld [vmem:[#allocation3 + $0x110] sm:$0xff]  ;;  %v287_v31 = vrot.slane %v93_v23, 4  ;;  %v192_v34 = vmax.f32 %v77_v21, %v191_v26  ;;  %v1589_v62 = vld [vmem:[#allocation6 + $0x48] sm:$0xff]  ;;  %v102_v21 = vld [vmem:[#allocation3 + $0x118] sm:$0xff] }
  0x17   :  { %1216 = vmatpush.bf16.msra.mxu1 %v1593_v9  ;;  %v109_v27 = vld [vmem:[#allocation3 + $0x150] sm:$0xff]  ;;  %v335_v32 = vrot.slane %v101_v24, 4  ;;  %v240_v37 = vmax.f32 %v85_v22, %v239_v30  ;;  %v145_v43 = vrot.slane %v144_v33, 2  ;;  %v1597_v3 = vld [vmem:[#allocation6 + $0x88] sm:$0xff]  ;;  %v70_v9 = vld [vmem:[#allocation3 + $0x18] sm:$0xff] }
  0x18   :  { %1229 = vmatpush.bf16.msra.mxu2 %v1601_v10  ;;  %v117_v28 = vld [vmem:[#allocation3 + $0x190] sm:$0xff]  ;;  %v383_v35 = vrot.slane %v109_v27, 4  ;;  %v288_v38 = vmax.f32 %v93_v23, %v287_v31  ;;  %v193_v44 = vrot.slane %v192_v34, 2  ;;  %v1605_v4 = vld [vmem:[#allocation6 + $0xc8] sm:$0xff]  ;;  %v1580_v22 = vld [vmem:[#allocation6] sm:$0xff] }
  0x19   :  { %1242 = vmatpush.bf16.msra.mxu3 %v1609_v11  ;;  %v125_v29 = vld [vmem:[#allocation3 + $0x1d0] sm:$0xff]  ;;  %v431_v36 = vrot.slane %v117_v28, 4  ;;  %v336_v39 = vmax.f32 %v101_v24, %v335_v32  ;;  %v241_v49 = vrot.slane %v240_v37, 2  ;;  %v146_v53 = vmax.f32 %v144_v33, %v145_v43  ;;  %v1588_v23 = vld [vmem:[#allocation6 + $0x40] sm:$0xff] }
  0x1a   :  { %1204 = vmatpush.bf16.msra.mxu0 %v1584_v12  ;;  %v479_v40 = vrot.slane %v125_v29, 4  ;;  %v1582_v41 = vld [vmem:[#allocation6 + $0x10] sm:$0xff]  ;;  %v384_v45 = vmax.f32 %v109_v27, %v383_v35  ;;  %v289_v50 = vrot.slane %v288_v38, 2  ;;  %v194_v54 = vmax.f32 %v192_v34, %v193_v44  ;;  %v110_v27 = vld [vmem:[#allocation3 + $0x158] sm:$0xff]  ;;  %v1604_v30 = vld [vmem:[#allocation6 + $0xc0] sm:$0xff] }
  0x1b   :  { %1217 = vmatpush.bf16.msra.mxu1 %v1592_v13  ;;  %v1590_v42 = vld [vmem:[#allocation6 + $0x50] sm:$0xff]  ;;  %v432_v46 = vmax.f32 %v117_v28, %v431_v36  ;;  %v337_v51 = vrot.slane %v336_v39, 2  ;;  %v242_v57 = vmax.f32 %v240_v37, %v241_v49  ;;  %v147_v63 = vrot.slane %v146_v53, 1  ;;  %v1619_v35 = vld [vmem:[#allocation6 + $0x138] sm:$0xff] }
  0x1c   :  { %1230 = vmatpush.bf16.msra.mxu2 %v1600_v14  ;;  %v1598_v47 = vld [vmem:[#allocation6 + $0x90] sm:$0xff]  ;;  %v480_v52 = vmax.f32 %v125_v29, %v479_v40  ;;  %v385_v55 = vrot.slane %v384_v45, 2  ;;  %v290_v58 = vmax.f32 %v288_v38, %v289_v50  ;;  %v195_v0 = vrot.slane %v194_v54, 1  ;;  %v78_v14 = vld [vmem:[#allocation3 + $0x58] sm:$0xff]  ;;  %v1596_v29 = vld [vmem:[#allocation6 + $0x80] sm:$0xff] }
  0x1d   :  { %1243 = vmatpush.bf16.msra.mxu3 %v1608_v15  ;;  %v1606_v48 = vld [vmem:[#allocation6 + $0xd0] sm:$0xff]  ;;  %v433_v56 = vrot.slane %v432_v46, 2  ;;  %v338_v59 = vmax.f32 %v336_v39, %v337_v51  ;;  %v243_v5 = vrot.slane %v242_v57, 1  ;;  %v148_v10 = vmax.f32 %v146_v53, %v147_v63  ;;  %v86_v15 = vld [vmem:[#allocation3 + $0x98] sm:$0xff] }
  0x1e   :  { %1205 = vmatpush.bf16.msra.mxu0 %v1583_v16  ;;  %v481_v60 = vrot.slane %v480_v52, 2  ;;  %v386_v1 = vmax.f32 %v384_v45, %v385_v55  ;;  %v291_v6 = vrot.slane %v290_v58, 1  ;;  %v196_v11 = vmax.f32 %v194_v54, %v195_v0  ;;  %v1627_v36 = vld [vmem:[#allocation6 + $0x178] sm:$0xff]  ;;  %v1634_v63 = vld [vmem:[#allocation6 + $0x1b0] sm:$0xff] }
  0x1f   :  { %1218 = vmatpush.bf16.msra.mxu1 %v1591_v17  ;;  %v434_v2 = vmax.f32 %v432_v46, %v433_v56  ;;  %v339_v7 = vrot.slane %v338_v59, 1  ;;  %v244_v16 = vmax.f32 %v242_v57, %v243_v5  ;;  %v149_v28 = vrot.slane %v70_v9, 4  ;;  %v1618_v56 = vld [vmem:[#allocation6 + $0x130] sm:$0xff] }
  0x20   :  { %1231 = vmatpush.bf16.msra.mxu2 %v1599_v18  ;;  %v482_v8 = vmax.f32 %v480_v52, %v481_v60  ;;  %v387_v12 = vrot.slane %v386_v1, 1  ;;  %v292_v17 = vmax.f32 %v290_v58, %v291_v6  ;;  %v600_v26 = vsel %vm579_vm0, %v196_v11, %v148_v10  ;;  %v118_v52 = vld [vmem:[#allocation3 + $0x198] sm:$0xff]  ;;  %v1626_v57 = vld [vmem:[#allocation6 + $0x170] sm:$0xff] }
  0x21   :  { %1244 = vmatpush.bf16.msra.mxu3 %v1607_v19  ;;  %v435_v13 = vrot.slane %v434_v2, 1  ;;  %v340_v18 = vmax.f32 %v338_v59, %v339_v7  ;;  %v601_v32 = vsel %vm581_vm1, %v244_v16, %v600_v26  ;;  %v197_v33 = vrot.slane %v78_v14, 4  ;;  %v126_v59 = vld [vmem:[#allocation3 + $0x1d8] sm:$0xff]  ;;  %v1642_v0 = vld [vmem:[#allocation6 + $0x1f0] sm:$0xff]  ;;  %v1641_v26 = vld [vmem:[#allocation6 + $0x1e8] sm:$0xff] }
  0x22   :  { %1206 = vmatpush.bf16.msra.mxu0 %v1582_v41  ;;  %v483_v19 = vrot.slane %v482_v8, 1  ;;  %v388_v24 = vmax.f32 %v386_v1, %v387_v12  ;;  %v245_v34 = vrot.slane %v86_v15, 4  ;;  %v602_v37 = vsel %vm583_vm2, %v292_v17, %v601_v32  ;;  %v1635_v41 = vld [vmem:[#allocation6 + $0x1b8] sm:$0xff] }
  0x23   :  { %1219 = vmatpush.bf16.msra.mxu1 %v1590_v42  ;;  %v436_v25 = vmax.f32 %v434_v2, %v435_v13  ;;  %v150_v38 = vmax.f32 %v70_v9, %v149_v28  ;;  %v293_v39 = vrot.slane %v94_v20, 4  ;;  %v341_v40 = vrot.slane %v102_v21, 4  ;;  %v1643_v42 = vld [vmem:[#allocation6 + $0x1f8] sm:$0xff]  ;;  %v67_v13 = vld [vmem:[#allocation3] sm:$0xff] }
  0x24   :  { %1232 = vmatpush.bf16.msra.mxu2 %v1598_v47  ;;  %v484_v31 = vmax.f32 %v482_v8, %v483_v19  ;;  %v603_v43 = vsel %vm585_vm3, %v340_v18, %v602_v37  ;;  %v198_v44 = vmax.f32 %v78_v14, %v197_v33  ;;  %v246_v45 = vmax.f32 %v86_v15, %v245_v34  ;;  %v1617_v18 = vld [vmem:[#allocation6 + $0x128] sm:$0xff] }
  0x25   :  { %1245 = vmatpush.bf16.msra.mxu3 %v1606_v48  ;;  %v389_v46 = vrot.slane %v110_v27, 4  ;;  %v604_v47 = vsel %vm587_vm4, %v388_v24, %v603_v43  ;;  %v151_v48 = vrot.slane %v150_v38, 2  ;;  %v294_v49 = vmax.f32 %v94_v20, %v293_v39  ;;  %v1625_v19 = vld [vmem:[#allocation6 + $0x168] sm:$0xff]  ;;  %v75_v20 = vld [vmem:[#allocation3 + $0x40] sm:$0xff] }
  0x26   :  { %1207 = vmatpush.bf16.msra.mxu0 %v1581_v61  ;;  %v342_v50 = vmax.f32 %v102_v21, %v341_v40  ;;  %v605_v51 = vsel %vm589_vm5, %v436_v25, %v604_v47  ;;  %v199_v53 = vrot.slane %v198_v44, 2  ;;  %v247_v54 = vrot.slane %v246_v45, 2  ;;  %v1633_v25 = vld [vmem:[#allocation6 + $0x1a8] sm:$0xff] }
  0x27   :  { %1220 = vmatpush.bf16.msra.mxu1 %v1589_v62  ;;  %v390_v55 = vmax.f32 %v110_v27, %v389_v46  ;;  %v606_v58 = vsel %vm591_vm6, %v484_v31, %v605_v51  ;;  %v152_v60 = vmax.f32 %v150_v38, %v151_v48  ;;  %v295_v61 = vrot.slane %v294_v49, 2  ;;  %v83_v27 = vld [vmem:[#allocation3 + $0x80] sm:$0xff] }
  0x28   :  { %1233 = vmatpush.bf16.msra.mxu2 %v1597_v3  ;;  %v343_v62 = vrot.slane %v342_v50, 2  ;;  %v679_v1 = vpack.c.bf16 %v606_v58, %v606_v58  ;;  %v200_v2 = vmax.f32 %v198_v44, %v199_v53  ;;  %v248_v3 = vmax.f32 %v246_v45, %v247_v54  ;;  %v91_v31 = vld [vmem:[#allocation3 + $0xc0] sm:$0xff] }
  0x29   :  { %1246 = vmatpush.bf16.msra.mxu3 %v1605_v4  ;;  %v391_v4 = vrot.slane %v390_v55, 2  ;;  %v153_v5 = vrot.slane %v152_v60, 1  ;;  %v296_v6 = vmax.f32 %v294_v49, %v295_v61  ;;  %v437_v8 = vrot.slane %v118_v52, 4  ;;  %v99_v45 = vld [vmem:[#allocation3 + $0x100] sm:$0xff] }
  0x2a   :  { %1208 = vmatpush.bf16.msra.mxu0 %v1580_v22  ;;  %v344_v7 = vmax.f32 %v342_v50, %v343_v62  ;;  %v201_v9 = vrot.slane %v200_v2, 1  ;;  %v249_v10 = vrot.slane %v248_v3, 1  ;;  %v485_v12 = vrot.slane %v126_v59, 4  ;;  %v1632_v48 = vld [vmem:[#allocation6 + $0x1a0] sm:$0xff] }
  0x2b   :  { %1221 = vmatpush.bf16.msra.mxu1 %v1588_v23  ;;  %v392_v11 = vmax.f32 %v390_v55, %v391_v4  ;;  %v154_v14 = vmax.f32 %v152_v60, %v153_v5  ;;  %v297_v15 = vrot.slane %v296_v6, 1  ;;  %v438_v17 = vmax.f32 %v118_v52, %v437_v8  ;;  %v1640_v49 = vld [vmem:[#allocation6 + $0x1e0] sm:$0xff] }
  0x2c   :  { %1234 = vmatpush.bf16.msra.mxu2 %v1596_v29  ;;  %v345_v16 = vrot.slane %v344_v7, 1  ;;  %v202_v21 = vmax.f32 %v200_v2, %v201_v9  ;;  %v250_v22 = vmax.f32 %v248_v3, %v249_v10  ;;  %v486_v24 = vmax.f32 %v126_v59, %v485_v12  ;;  %v107_v52 = vld [vmem:[#allocation3 + $0x140] sm:$0xff]  ;;  %v68_v9 = vld [vmem:[#allocation3 + $0x8] sm:$0xff] }
  0x2d   :  { %1247 = vmatpush.bf16.msra.mxu3 %v1604_v30  ;;  %v393_v23 = vrot.slane %v392_v11, 1  ;;  %v298_v28 = vmax.f32 %v296_v6, %v297_v15  ;;  %v439_v30 = vrot.slane %v438_v17, 2  ;;  %v131_v32 = vrot.slane %v67_v13, 4  ;;  %v115_v4 = vld [vmem:[#allocation3 + $0x180] sm:$0xff]  ;;  %v1623_v15 = vld [vmem:[#allocation6 + $0x158] sm:$0xff] }
  0x2e   :  { %1253 = vmatpush.bf16.msrb.mxu0 %v1619_v35  ;;  %v346_v29 = vmax.f32 %v344_v7, %v345_v16  ;;  %v487_v34 = vrot.slane %v486_v24, 2  ;;  %v607_v35 = vsel %vm579_vm0, %v202_v21, %v154_v14  ;;  %v227_v40 = vrot.slane %v83_v27, 4  ;;  %v123_v5 = vld [vmem:[#allocation3 + $0x1c0] sm:$0xff]  ;;  %v1615_v14 = vld [vmem:[#allocation6 + $0x118] sm:$0xff] }
  0x2f   :  { %1266 = vmatpush.bf16.msrb.mxu1 %v1627_v36  ;;  %1235 = vmatmul.bf16.vlgmr.msra.gmra.mxu2 %v679_v1  ;;  %v394_v33 = vmax.f32 %v392_v11, %v393_v23  ;;  %v179_v36 = vrot.slane %v75_v20, 4  ;;  %v440_v37 = vmax.f32 %v438_v17, %v439_v30  ;;  %v608_v38 = vsel %vm581_vm1, %v250_v22, %v607_v35  ;;  %v1631_v16 = vld [vmem:[#allocation6 + $0x198] sm:$0xff] }
  0x30   :  { %1279 = vmatpush.bf16.msrb.mxu2 %v1635_v41  ;;  %v132_v39 = vmax.f32 %v67_v13, %v131_v32  ;;  %v1616_v41 = vld [vmem:[#allocation6 + $0x120] sm:$0xff]  ;;  %v488_v43 = vmax.f32 %v486_v24, %v487_v34  ;;  %v609_v44 = vsel %vm583_vm2, %v298_v28, %v608_v38  ;;  %v275_v47 = vrot.slane %v91_v31, 4  ;;  %v1639_v21 = vld [vmem:[#allocation6 + $0x1d8] sm:$0xff]  ;;  %v84_v38 = vld [vmem:[#allocation3 + $0x88] sm:$0xff] }
  0x31   :  { %1292 = vmatpush.bf16.msrb.mxu3 %v1643_v42  ;;  %v1624_v42 = vld [vmem:[#allocation6 + $0x160] sm:$0xff]  ;;  %v180_v46 = vmax.f32 %v75_v20, %v179_v36  ;;  %v441_v50 = vrot.slane %v440_v37, 1  ;;  %v610_v51 = vsel %vm585_vm3, %v346_v29, %v609_v44  ;;  %v228_v54 = vmax.f32 %v83_v27, %v227_v40  ;;  %v1622_v27 = vld [vmem:[#allocation6 + $0x150] sm:$0xff] }
  0x32   :  { %1254 = vmatpush.bf16.msrb.mxu0 %v1618_v56  ;;  %v133_v53 = vrot.slane %v132_v39, 2  ;;  %v489_v55 = vrot.slane %v488_v43, 1  ;;  %v611_v56 = vsel %vm587_vm4, %v394_v33, %v610_v51  ;;  %v276_v58 = vmax.f32 %v91_v31, %v275_v47  ;;  %v76_v31 = vld [vmem:[#allocation3 + $0x48] sm:$0xff]  ;;  %v1630_v33 = vld [vmem:[#allocation6 + $0x190] sm:$0xff] }
  0x33   :  { %1267 = vmatpush.bf16.msrb.mxu1 %v1626_v57  ;;  %v181_v57 = vrot.slane %v180_v46, 2  ;;  %v442_v59 = vmax.f32 %v440_v37, %v441_v50  ;;  %v229_v61 = vrot.slane %v228_v54, 2  ;;  %v323_v62 = vrot.slane %v99_v45, 4  ;;  %v1621_v50 = vld [vmem:[#allocation6 + $0x148] sm:$0xff] }
  0x34   :  { %1280 = vmatpush.bf16.msrb.mxu2 %v1634_v63  ;;  %v134_v60 = vmax.f32 %v132_v39, %v133_v53  ;;  %v490_v63 = vmax.f32 %v488_v43, %v489_v55  ;;  %v277_v1 = vrot.slane %v276_v58, 2  ;;  %v371_v2 = vrot.slane %v107_v52, 4  ;;  %v1638_v39 = vld [vmem:[#allocation6 + $0x1d0] sm:$0xff]  ;;  %v92_v43 = vld [vmem:[#allocation3 + $0xc8] sm:$0xff] }
  0x35   :  { %1293 = vmatpush.bf16.msrb.mxu3 %v1642_v0  ;;  %v182_v0 = vmax.f32 %v180_v46, %v181_v57  ;;  %v612_v3 = vsel %vm589_vm5, %v442_v59, %v611_v56  ;;  %v230_v7 = vmax.f32 %v228_v54, %v229_v61  ;;  %v324_v8 = vmax.f32 %v99_v45, %v323_v62  ;;  %v1629_v55 = vld [vmem:[#allocation6 + $0x188] sm:$0xff] }
  0x36   :  { %1255 = vmatpush.bf16.msrb.mxu0 %v1617_v18  ;;  %v135_v6 = vrot.slane %v134_v60, 1  ;;  %v613_v10 = vsel %vm591_vm6, %v490_v63, %v612_v3  ;;  %v278_v12 = vmax.f32 %v276_v58, %v277_v1  ;;  %v372_v13 = vmax.f32 %v107_v52, %v371_v2  ;;  %v100_v58 = vld [vmem:[#allocation3 + $0x108] sm:$0xff] }
  0x37   :  { %1268 = vmatpush.bf16.msrb.mxu1 %v1625_v19  ;;  %v183_v11 = vrot.slane %v182_v0, 1  ;;  %v680_v17 = vpack.c.bf16 %v613_v10, %v613_v10  ;;  %v231_v19 = vrot.slane %v230_v7, 1  ;;  %v325_v20 = vrot.slane %v324_v8, 2  ;;  %v1637_v61 = vld [vmem:[#allocation6 + $0x1c8] sm:$0xff] }
  0x38   :  { %1281 = vmatpush.bf16.msrb.mxu2 %v1633_v25  ;;  %v136_v18 = vmax.f32 %v134_v60, %v135_v6  ;;  %v279_v23 = vrot.slane %v278_v12, 1  ;;  %v373_v24 = vrot.slane %v372_v13, 2  ;;  %v419_v25 = vrot.slane %v115_v4, 4 }
  0x39   :  { %1294 = vmatpush.bf16.msrb.mxu3 %v1641_v26  ;;  %v184_v22 = vmax.f32 %v182_v0, %v183_v11  ;;  %v1614_v26 = vld [vmem:[#allocation6 + $0x110] sm:$0xff]  ;;  %v232_v28 = vmax.f32 %v230_v7, %v231_v19  ;;  %v326_v29 = vmax.f32 %v324_v8, %v325_v20  ;;  %v467_v30 = vrot.slane %v123_v5, 4  ;;  %v108_v0 = vld [vmem:[#allocation3 + $0x148] sm:$0xff]  ;;  %v1612_v7 = vld [vmem:[#allocation6 + $0x100] sm:$0xff] }
  0x3a   :  { %1256 = vmatpush.bf16.msrb.mxu0 %v1616_v41  ;;  %1248 = vmatmul.bf16.vlgmr.msra.gmra.mxu3 %v680_v17  ;;  %v137_v32 = vrot.slane %v68_v9, 4  ;;  %v280_v34 = vmax.f32 %v278_v12, %v279_v23  ;;  %v374_v35 = vmax.f32 %v372_v13, %v373_v24  ;;  %v420_v36 = vmax.f32 %v115_v4, %v419_v25  ;;  %v1620_v8 = vld [vmem:[#allocation6 + $0x140] sm:$0xff]  ;;  %v124_v25 = vld [vmem:[#allocation3 + $0x1c8] sm:$0xff] }
  0x3b   :  { %1269 = vmatpush.bf16.msrb.mxu1 %v1624_v42  ;;  %v580_v37 = vsel %vm579_vm0, %v184_v22, %v136_v18  ;;  %v327_v40 = vrot.slane %v326_v29, 1  ;;  %v468_v41 = vmax.f32 %v123_v5, %v467_v30  ;;  %v233_v54 = vrot.slane %v84_v38, 4  ;;  %v1628_v13 = vld [vmem:[#allocation6 + $0x180] sm:$0xff] }
  0x3c   :  { %1282 = vmatpush.bf16.msrb.mxu2 %v1632_v48  ;;  %v582_v42 = vsel %vm581_vm1, %v232_v28, %v580_v37  ;;  %v138_v44 = vmax.f32 %v68_v9, %v137_v32  ;;  %v375_v45 = vrot.slane %v374_v35, 1  ;;  %v421_v46 = vrot.slane %v420_v36, 2  ;;  %v1636_v19 = vld [vmem:[#allocation6 + $0x1c0] sm:$0xff] }
  0x3d   :  { %1295 = vmatpush.bf16.msrb.mxu3 %v1640_v49  ;;  %v584_v47 = vsel %vm583_vm2, %v280_v34, %v582_v42  ;;  %v185_v48 = vrot.slane %v76_v31, 4  ;;  %v1613_v49 = vld [vmem:[#allocation6 + $0x108] sm:$0xff]  ;;  %v328_v51 = vmax.f32 %v326_v29, %v327_v40  ;;  %v469_v52 = vrot.slane %v468_v41, 2  ;;  %v79_v42 = vld [vmem:[#allocation3 + $0x60] sm:$0xff] }
  0x3e   :  { %1257 = vmatpush.bf16.msrb.mxu0 %v1615_v14  ;;  %v139_v53 = vrot.slane %v138_v44, 2  ;;  %v376_v56 = vmax.f32 %v374_v35, %v375_v45  ;;  %v422_v57 = vmax.f32 %v420_v36, %v421_v46  ;;  %v281_v60 = vrot.slane %v92_v43, 4  ;;  %v87_v46 = vld [vmem:[#allocation3 + $0xa0] sm:$0xff] }
  0x3f   :  { %1270 = vmatpush.bf16.msrb.mxu1 %v1623_v15  ;;  %v186_v59 = vmax.f32 %v76_v31, %v185_v48  ;;  %v470_v62 = vmax.f32 %v468_v41, %v469_v52  ;;  %v586_v63 = vsel %vm585_vm3, %v328_v51, %v584_v47  ;;  %v234_v2 = vmax.f32 %v84_v38, %v233_v54  ;;  %v116_v15 = vld [vmem:[#allocation3 + $0x188] sm:$0xff]  ;;  %v95_v52 = vld [vmem:[#allocation3 + $0xe0] sm:$0xff] }
  0x40   :  { %1283 = vmatpush.bf16.msrb.mxu2 %v1631_v16  ;;  %v140_v1 = vmax.f32 %v138_v44, %v139_v53  ;;  %v423_v3 = vrot.slane %v422_v57, 1  ;;  %v588_v4 = vsel %vm587_vm4, %v376_v56, %v586_v63  ;;  %v282_v6 = vmax.f32 %v92_v43, %v281_v60 }
  0x41   :  { %1296 = vmatpush.bf16.msrb.mxu3 %v1639_v21  ;;  %v187_v5 = vrot.slane %v186_v59, 2  ;;  %v471_v9 = vrot.slane %v470_v62, 1  ;;  %v235_v11 = vrot.slane %v234_v2, 2  ;;  %v329_v12 = vrot.slane %v100_v58, 4 }
  0x42   :  { %1258 = vmatpush.bf16.msrb.mxu0 %v1614_v26  ;;  %v141_v10 = vrot.slane %v140_v1, 1  ;;  %v424_v14 = vmax.f32 %v422_v57, %v423_v3  ;;  %v283_v17 = vrot.slane %v282_v6, 2  ;;  %v377_v18 = vrot.slane %v108_v0, 4 }
  0x43   :  { %1271 = vmatpush.bf16.msrb.mxu1 %v1622_v27  ;;  %v188_v16 = vmax.f32 %v186_v59, %v187_v5  ;;  %v472_v20 = vmax.f32 %v470_v62, %v471_v9  ;;  %v236_v22 = vmax.f32 %v234_v2, %v235_v11  ;;  %v330_v23 = vmax.f32 %v100_v58, %v329_v12  ;;  %v103_v62 = vld [vmem:[#allocation3 + $0x120] sm:$0xff] }
  0x44   :  { %1284 = vmatpush.bf16.msrb.mxu2 %v1630_v33  ;;  %v142_v21 = vmax.f32 %v140_v1, %v141_v10  ;;  %v590_v24 = vsel %vm589_vm5, %v424_v14, %v588_v4  ;;  %v284_v27 = vmax.f32 %v282_v6, %v283_v17  ;;  %v378_v28 = vmax.f32 %v108_v0, %v377_v18  ;;  %v71_v33 = vld [vmem:[#allocation3 + $0x20] sm:$0xff] }
  0x45   :  { %1297 = vmatpush.bf16.msrb.mxu3 %v1638_v39  ;;  %v189_v26 = vrot.slane %v188_v16, 1  ;;  %v592_v29 = vsel %vm591_vm6, %v472_v20, %v590_v24  ;;  %v237_v30 = vrot.slane %v236_v22, 1  ;;  %v331_v31 = vrot.slane %v330_v23, 2  ;;  %v111_v5 = vld [vmem:[#allocation3 + $0x160] sm:$0xff] }
  0x46   :  { %1259 = vmatpush.bf16.msrb.mxu0 %v1613_v49  ;;  %v425_v32 = vrot.slane %v116_v15, 4  ;;  %v677_v34 = vpack.c.bf16 %v592_v29, %v592_v29  ;;  %v285_v36 = vrot.slane %v284_v27, 1  ;;  %v379_v37 = vrot.slane %v378_v28, 2  ;;  %v127_v24 = vld [vmem:[#allocation3 + $0x1e0] sm:$0xff] }
  0x47   :  { %1272 = vmatpush.bf16.msrb.mxu1 %v1621_v50  ;;  %v190_v35 = vmax.f32 %v188_v16, %v189_v26  ;;  %v238_v38 = vmax.f32 %v236_v22, %v237_v30  ;;  %v332_v39 = vmax.f32 %v330_v23, %v331_v31  ;;  %v473_v41 = vrot.slane %v124_v25, 4 }
  0x48   :  { %1285 = vmatpush.bf16.msrb.mxu2 %v1629_v55  ;;  %v426_v40 = vmax.f32 %v116_v15, %v425_v32  ;;  %1209 = vmatmul.bf16.vlgmr.msra.gmra.mxu0 %v677_v34  ;;  %v286_v43 = vmax.f32 %v284_v27, %v285_v36  ;;  %v380_v44 = vmax.f32 %v378_v28, %v379_v37  ;;  %v155_v47 = vrot.slane %v71_v33, 4  ;;  %v119_v15 = vld [vmem:[#allocation3 + $0x1a0] sm:$0xff] }
  0x49   :  { %1298 = vmatpush.bf16.msrb.mxu3 %v1637_v61  ;;  %v593_v45 = vsel %vm579_vm0, %v190_v35, %v142_v21  ;;  %v333_v48 = vrot.slane %v332_v39, 1  ;;  %v474_v50 = vmax.f32 %v124_v25, %v473_v41  ;;  %v203_v56 = vrot.slane %v79_v42, 4 }
  0x4a   :  { %1260 = vmatpush.bf16.msrb.mxu0 %v1612_v7  ;;  %v427_v49 = vrot.slane %v426_v40, 2  ;;  %v594_v51 = vsel %vm581_vm1, %v238_v38, %v593_v45  ;;  %v381_v53 = vrot.slane %v380_v44, 1  ;;  %v156_v55 = vmax.f32 %v71_v33, %v155_v47  ;;  %v72_v33 = vld [vmem:[#allocation3 + $0x28] sm:$0xff] }
  0x4b   :  { %1273 = vmatpush.bf16.msrb.mxu1 %v1620_v8  ;;  %v595_v54 = vsel %vm583_vm2, %v286_v43, %v594_v51  ;;  %v334_v57 = vmax.f32 %v332_v39, %v333_v48  ;;  %v475_v59 = vrot.slane %v474_v50, 2  ;;  %v251_v60 = vrot.slane %v87_v46, 4 }
  0x4c   :  { %1286 = vmatpush.bf16.msrb.mxu2 %v1628_v13  ;;  %v428_v58 = vmax.f32 %v426_v40, %v427_v49  ;;  %v382_v61 = vmax.f32 %v380_v44, %v381_v53  ;;  %v157_v63 = vrot.slane %v156_v55, 2  ;;  %v204_v0 = vmax.f32 %v79_v42, %v203_v56  ;;  %v80_v42 = vld [vmem:[#allocation3 + $0x68] sm:$0xff] }
  0x4d   :  { %1299 = vmatpush.bf16.msrb.mxu3 %v1636_v19  ;;  %v299_v1 = vrot.slane %v95_v52, 4  ;;  %v476_v3 = vmax.f32 %v474_v50, %v475_v59  ;;  %v596_v4 = vsel %vm585_vm3, %v334_v57, %v595_v54  ;;  %v252_v6 = vmax.f32 %v87_v46, %v251_v60  ;;  %v88_v46 = vld [vmem:[#allocation3 + $0xa8] sm:$0xff] }
  0x4e   :  { %v429_v2 = vrot.slane %v428_v58, 1  ;;  %v597_v7 = vsel %vm587_vm4, %v382_v61, %v596_v4  ;;  %v158_v8 = vmax.f32 %v156_v55, %v157_v63  ;;  %v205_v9 = vrot.slane %v204_v0, 2 }
  0x4f   :  { %v300_v10 = vmax.f32 %v95_v52, %v299_v1  ;;  %v477_v12 = vrot.slane %v476_v3, 1  ;;  %v253_v13 = vrot.slane %v252_v6, 2  ;;  %v347_v14 = vrot.slane %v103_v62, 4  ;;  %v96_v52 = vld [vmem:[#allocation3 + $0xe8] sm:$0xff] }
  0x50   :  { %v430_v11 = vmax.f32 %v428_v58, %v429_v2  ;;  %v159_v16 = vrot.slane %v158_v8, 1  ;;  %v206_v17 = vmax.f32 %v204_v0, %v205_v9  ;;  %v395_v19 = vrot.slane %v111_v5, 4 }
  0x51   :  { %v301_v18 = vrot.slane %v300_v10, 2  ;;  %v478_v20 = vmax.f32 %v476_v3, %v477_v12  ;;  %v254_v22 = vmax.f32 %v252_v6, %v253_v13  ;;  %v348_v23 = vmax.f32 %v103_v62, %v347_v14  ;;  %v104_v62 = vld [vmem:[#allocation3 + $0x128] sm:$0xff] }
  0x52   :  { %v598_v21 = vsel %vm589_vm5, %v430_v11, %v597_v7  ;;  %v160_v25 = vmax.f32 %v158_v8, %v159_v16  ;;  %v207_v26 = vrot.slane %v206_v17, 1  ;;  %v396_v28 = vmax.f32 %v111_v5, %v395_v19  ;;  %v112_v5 = vld [vmem:[#allocation3 + $0x168] sm:$0xff] }
  0x53   :  { %v302_v27 = vmax.f32 %v300_v10, %v301_v18  ;;  %v599_v29 = vsel %vm591_vm6, %v478_v20, %v598_v21  ;;  %v255_v30 = vrot.slane %v254_v22, 1  ;;  %v349_v31 = vrot.slane %v348_v23, 2 }
  0x54   :  { %v443_v32 = vrot.slane %v119_v15, 4  ;;  %v678_v34 = vpack.c.bf16 %v599_v29, %v599_v29  ;;  %v208_v35 = vmax.f32 %v206_v17, %v207_v26  ;;  %v397_v37 = vrot.slane %v396_v28, 2 }
  0x55   :  { %v303_v36 = vrot.slane %v302_v27, 1  ;;  %v256_v38 = vmax.f32 %v254_v22, %v255_v30  ;;  %v350_v39 = vmax.f32 %v348_v23, %v349_v31  ;;  %v491_v41 = vrot.slane %v127_v24, 4 }
  0x56   :  { %v444_v40 = vmax.f32 %v119_v15, %v443_v32  ;;  %1222 = vmatmul.bf16.vlgmr.msra.gmra.mxu1 %v678_v34  ;;  %v398_v44 = vmax.f32 %v396_v28, %v397_v37  ;;  %v614_v45 = vsel %vm579_vm0, %v208_v35, %v160_v25  ;;  %v161_v47 = vrot.slane %v72_v33, 4  ;;  %v120_v15 = vld [vmem:[#allocation3 + $0x1a8] sm:$0xff] }
  0x57   :  { %v304_v43 = vmax.f32 %v302_v27, %v303_v36  ;;  %v351_v48 = vrot.slane %v350_v39, 1  ;;  %v492_v50 = vmax.f32 %v127_v24, %v491_v41  ;;  %v615_v51 = vsel %vm581_vm1, %v256_v38, %v614_v45  ;;  %v128_v24 = vld [vmem:[#allocation3 + $0x1e8] sm:$0xff] }
  0x58   :  { %v445_v49 = vrot.slane %v444_v40, 2  ;;  %v399_v53 = vrot.slane %v398_v44, 1  ;;  %v162_v55 = vmax.f32 %v72_v33, %v161_v47  ;;  %v209_v56 = vrot.slane %v80_v42, 4  ;;  %v73_v33 = vld [vmem:[#allocation3 + $0x30] sm:$0xff] }
  0x59   :  { %v616_v54 = vsel %vm583_vm2, %v304_v43, %v615_v51  ;;  %v352_v57 = vmax.f32 %v350_v39, %v351_v48  ;;  %v493_v59 = vrot.slane %v492_v50, 2  ;;  %v257_v60 = vrot.slane %v88_v46, 4 }
  0x5a   :  { %v446_v58 = vmax.f32 %v444_v40, %v445_v49  ;;  %v400_v61 = vmax.f32 %v398_v44, %v399_v53  ;;  %v163_v63 = vrot.slane %v162_v55, 2  ;;  %v210_v0 = vmax.f32 %v80_v42, %v209_v56  ;;  %v81_v42 = vld [vmem:[#allocation3 + $0x70] sm:$0xff] }
  0x5b   :  { %v305_v1 = vrot.slane %v96_v52, 4  ;;  %v494_v3 = vmax.f32 %v492_v50, %v493_v59  ;;  %v617_v4 = vsel %vm585_vm3, %v352_v57, %v616_v54  ;;  %v258_v6 = vmax.f32 %v88_v46, %v257_v60  ;;  %v89_v46 = vld [vmem:[#allocation3 + $0xb0] sm:$0xff] }
  0x5c   :  { %v447_v2 = vrot.slane %v446_v58, 1  ;;  %v618_v7 = vsel %vm587_vm4, %v400_v61, %v617_v4  ;;  %v164_v8 = vmax.f32 %v162_v55, %v163_v63  ;;  %v211_v9 = vrot.slane %v210_v0, 2 }
  0x5d   :  { %v306_v10 = vmax.f32 %v96_v52, %v305_v1  ;;  %v495_v12 = vrot.slane %v494_v3, 1  ;;  %v259_v13 = vrot.slane %v258_v6, 2  ;;  %v353_v14 = vrot.slane %v104_v62, 4  ;;  %v97_v52 = vld [vmem:[#allocation3 + $0xf0] sm:$0xff] }
  0x5e   :  { %v448_v11 = vmax.f32 %v446_v58, %v447_v2  ;;  %v165_v16 = vrot.slane %v164_v8, 1  ;;  %v212_v17 = vmax.f32 %v210_v0, %v211_v9  ;;  %v401_v19 = vrot.slane %v112_v5, 4 }
  0x5f   :  { %v307_v18 = vrot.slane %v306_v10, 2  ;;  %v496_v20 = vmax.f32 %v494_v3, %v495_v12  ;;  %v260_v22 = vmax.f32 %v258_v6, %v259_v13  ;;  %v354_v23 = vmax.f32 %v104_v62, %v353_v14  ;;  %v105_v62 = vld [vmem:[#allocation3 + $0x130] sm:$0xff] }
  0x60   :  { %v619_v21 = vsel %vm589_vm5, %v448_v11, %v618_v7  ;;  %v166_v25 = vmax.f32 %v164_v8, %v165_v16  ;;  %v213_v26 = vrot.slane %v212_v17, 1  ;;  %v402_v28 = vmax.f32 %v112_v5, %v401_v19  ;;  %v113_v5 = vld [vmem:[#allocation3 + $0x170] sm:$0xff] }
  0x61   :  { %v308_v27 = vmax.f32 %v306_v10, %v307_v18  ;;  %v620_v29 = vsel %vm591_vm6, %v496_v20, %v619_v21  ;;  %v261_v30 = vrot.slane %v260_v22, 1  ;;  %v355_v31 = vrot.slane %v354_v23, 2 }
  0x62   :  { %v449_v32 = vrot.slane %v120_v15, 4  ;;  %v681_v34 = vpack.c.bf16 %v620_v29, %v620_v29  ;;  %v214_v35 = vmax.f32 %v212_v17, %v213_v26  ;;  %v403_v37 = vrot.slane %v402_v28, 2 }
  0x63   :  { %v309_v36 = vrot.slane %v308_v27, 1  ;;  %v262_v38 = vmax.f32 %v260_v22, %v261_v30  ;;  %v356_v39 = vmax.f32 %v354_v23, %v355_v31  ;;  %v497_v41 = vrot.slane %v128_v24, 4 }
  0x64   :  { %v450_v40 = vmax.f32 %v120_v15, %v449_v32  ;;  %1261 = vmatmul.bf16.vlgmr.msrb.gmra.mxu0 %v681_v34  ;;  %v404_v44 = vmax.f32 %v402_v28, %v403_v37  ;;  %v621_v45 = vsel %vm579_vm0, %v214_v35, %v166_v25  ;;  %v167_v47 = vrot.slane %v73_v33, 4  ;;  %v121_v15 = vld [vmem:[#allocation3 + $0x1b0] sm:$0xff] }
  0x65   :  { %v310_v43 = vmax.f32 %v308_v27, %v309_v36  ;;  %v357_v48 = vrot.slane %v356_v39, 1  ;;  %v498_v50 = vmax.f32 %v128_v24, %v497_v41  ;;  %v622_v51 = vsel %vm581_vm1, %v262_v38, %v621_v45  ;;  %v129_v24 = vld [vmem:[#allocation3 + $0x1f0] sm:$0xff] }
  0x66   :  { %v451_v49 = vrot.slane %v450_v40, 2  ;;  %v405_v53 = vrot.slane %v404_v44, 1  ;;  %v168_v55 = vmax.f32 %v73_v33, %v167_v47  ;;  %v215_v56 = vrot.slane %v81_v42, 4  ;;  %v74_v33 = vld [vmem:[#allocation3 + $0x38] sm:$0xff] }
  0x67   :  { %v623_v54 = vsel %vm583_vm2, %v310_v43, %v622_v51  ;;  %v358_v57 = vmax.f32 %v356_v39, %v357_v48  ;;  %v499_v59 = vrot.slane %v498_v50, 2  ;;  %v263_v60 = vrot.slane %v89_v46, 4 }
  0x68   :  { %v452_v58 = vmax.f32 %v450_v40, %v451_v49  ;;  %v406_v61 = vmax.f32 %v404_v44, %v405_v53  ;;  %v169_v63 = vrot.slane %v168_v55, 2  ;;  %v216_v0 = vmax.f32 %v81_v42, %v215_v56  ;;  %v82_v42 = vld [vmem:[#allocation3 + $0x78] sm:$0xff] }
  0x69   :  { %v311_v1 = vrot.slane %v97_v52, 4  ;;  %v500_v3 = vmax.f32 %v498_v50, %v499_v59  ;;  %v624_v4 = vsel %vm585_vm3, %v358_v57, %v623_v54  ;;  %v264_v6 = vmax.f32 %v89_v46, %v263_v60  ;;  %v90_v46 = vld [vmem:[#allocation3 + $0xb8] sm:$0xff] }
  0x6a   :  { %v453_v2 = vrot.slane %v452_v58, 1  ;;  %v625_v7 = vsel %vm587_vm4, %v406_v61, %v624_v4  ;;  %v170_v8 = vmax.f32 %v168_v55, %v169_v63  ;;  %v217_v9 = vrot.slane %v216_v0, 2 }
  0x6b   :  { %v312_v10 = vmax.f32 %v97_v52, %v311_v1  ;;  %v501_v12 = vrot.slane %v500_v3, 1  ;;  %v265_v13 = vrot.slane %v264_v6, 2  ;;  %v359_v14 = vrot.slane %v105_v62, 4  ;;  %v98_v52 = vld [vmem:[#allocation3 + $0xf8] sm:$0xff] }
  0x6c   :  { %v454_v11 = vmax.f32 %v452_v58, %v453_v2  ;;  %v171_v16 = vrot.slane %v170_v8, 1  ;;  %v218_v17 = vmax.f32 %v216_v0, %v217_v9  ;;  %v407_v19 = vrot.slane %v113_v5, 4 }
  0x6d   :  { %v313_v18 = vrot.slane %v312_v10, 2  ;;  %v502_v20 = vmax.f32 %v500_v3, %v501_v12  ;;  %v266_v22 = vmax.f32 %v264_v6, %v265_v13  ;;  %v360_v23 = vmax.f32 %v105_v62, %v359_v14  ;;  %v106_v62 = vld [vmem:[#allocation3 + $0x138] sm:$0xff] }
  0x6e   :  { %v626_v21 = vsel %vm589_vm5, %v454_v11, %v625_v7  ;;  %v172_v25 = vmax.f32 %v170_v8, %v171_v16  ;;  %v219_v26 = vrot.slane %v218_v17, 1  ;;  %v408_v28 = vmax.f32 %v113_v5, %v407_v19  ;;  %v114_v5 = vld [vmem:[#allocation3 + $0x178] sm:$0xff] }
  0x6f   :  { %v314_v27 = vmax.f32 %v312_v10, %v313_v18  ;;  %v627_v29 = vsel %vm591_vm6, %v502_v20, %v626_v21  ;;  %v267_v30 = vrot.slane %v266_v22, 1  ;;  %v361_v31 = vrot.slane %v360_v23, 2 }
  0x70   :  { %v455_v32 = vrot.slane %v121_v15, 4  ;;  %v682_v34 = vpack.c.bf16 %v627_v29, %v627_v29  ;;  %v220_v35 = vmax.f32 %v218_v17, %v219_v26  ;;  %v409_v37 = vrot.slane %v408_v28, 2 }
  0x71   :  { %v315_v36 = vrot.slane %v314_v27, 1  ;;  %v268_v38 = vmax.f32 %v266_v22, %v267_v30  ;;  %v362_v39 = vmax.f32 %v360_v23, %v361_v31  ;;  %v503_v41 = vrot.slane %v129_v24, 4 }
  0x72   :  { %v456_v40 = vmax.f32 %v121_v15, %v455_v32  ;;  %1274 = vmatmul.bf16.vlgmr.msrb.gmra.mxu1 %v682_v34  ;;  %v410_v44 = vmax.f32 %v408_v28, %v409_v37  ;;  %v628_v45 = vsel %vm579_vm0, %v220_v35, %v172_v25  ;;  %v173_v47 = vrot.slane %v74_v33, 4  ;;  %v122_v15 = vld [vmem:[#allocation3 + $0x1b8] sm:$0xff] }
  0x73   :  { %v316_v43 = vmax.f32 %v314_v27, %v315_v36  ;;  %v363_v48 = vrot.slane %v362_v39, 1  ;;  %v504_v50 = vmax.f32 %v129_v24, %v503_v41  ;;  %v629_v51 = vsel %vm581_vm1, %v268_v38, %v628_v45  ;;  %v130_v24 = vld [vmem:[#allocation3 + $0x1f8] sm:$0xff] }
  0x74   :  { %v457_v49 = vrot.slane %v456_v40, 2  ;;  %v411_v53 = vrot.slane %v410_v44, 1  ;;  %v174_v55 = vmax.f32 %v74_v33, %v173_v47  ;;  %v221_v56 = vrot.slane %v82_v42, 4 }
  0x75   :  { %v630_v54 = vsel %vm583_vm2, %v316_v43, %v629_v51  ;;  %v364_v57 = vmax.f32 %v362_v39, %v363_v48  ;;  %v505_v59 = vrot.slane %v504_v50, 2  ;;  %v269_v60 = vrot.slane %v90_v46, 4 }
  0x76   :  { %v458_v58 = vmax.f32 %v456_v40, %v457_v49  ;;  %v412_v61 = vmax.f32 %v410_v44, %v411_v53  ;;  %v175_v63 = vrot.slane %v174_v55, 2  ;;  %v222_v0 = vmax.f32 %v82_v42, %v221_v56 }
  0x77   :  { %v317_v1 = vrot.slane %v98_v52, 4  ;;  %v506_v3 = vmax.f32 %v504_v50, %v505_v59  ;;  %v631_v4 = vsel %vm585_vm3, %v364_v57, %v630_v54  ;;  %v270_v6 = vmax.f32 %v90_v46, %v269_v60 }
  0x78   :  { %v459_v2 = vrot.slane %v458_v58, 1  ;;  %v632_v7 = vsel %vm587_vm4, %v412_v61, %v631_v4  ;;  %v176_v8 = vmax.f32 %v174_v55, %v175_v63  ;;  %v223_v9 = vrot.slane %v222_v0, 2 }
  0x79   :  { %v318_v10 = vmax.f32 %v98_v52, %v317_v1  ;;  %v507_v12 = vrot.slane %v506_v3, 1  ;;  %v271_v13 = vrot.slane %v270_v6, 2  ;;  %v365_v14 = vrot.slane %v106_v62, 4 }
  0x7a   :  { %v460_v11 = vmax.f32 %v458_v58, %v459_v2  ;;  %v177_v16 = vrot.slane %v176_v8, 1  ;;  %v224_v17 = vmax.f32 %v222_v0, %v223_v9  ;;  %v413_v19 = vrot.slane %v114_v5, 4 }
  0x7b   :  { %v319_v18 = vrot.slane %v318_v10, 2  ;;  %v508_v20 = vmax.f32 %v506_v3, %v507_v12  ;;  %v272_v22 = vmax.f32 %v270_v6, %v271_v13  ;;  %v366_v23 = vmax.f32 %v106_v62, %v365_v14 }
  0x7c   :  { %v633_v21 = vsel %vm589_vm5, %v460_v11, %v632_v7  ;;  %v178_v25 = vmax.f32 %v176_v8, %v177_v16  ;;  %v225_v26 = vrot.slane %v224_v17, 1  ;;  %v414_v28 = vmax.f32 %v114_v5, %v413_v19  ;;  %v1650_v5 = vld [vmem:[%s1825_s2] ss:$0 sm:$0xff] }
  0x7d   :  { %v320_v27 = vmax.f32 %v318_v10, %v319_v18  ;;  %v634_v29 = vsel %vm591_vm6, %v508_v20, %v633_v21  ;;  %v273_v30 = vrot.slane %v272_v22, 1  ;;  %v367_v31 = vrot.slane %v366_v23, 2 }
  0x7e   :  { %v461_v32 = vrot.slane %v122_v15, 4  ;;  %v683_v33 = vpack.c.bf16 %v634_v29, %v634_v29  ;;  %v226_v34 = vmax.f32 %v224_v17, %v225_v26  ;;  %v415_v36 = vrot.slane %v414_v28, 2 }
  0x7f   :  { %v321_v35 = vrot.slane %v320_v27, 1  ;;  %v274_v37 = vmax.f32 %v272_v22, %v273_v30  ;;  %v368_v38 = vmax.f32 %v366_v23, %v367_v31  ;;  %v509_v40 = vrot.slane %v130_v24, 4 }
  0x80   :  { %v462_v39 = vmax.f32 %v122_v15, %v461_v32  ;;  %1287 = vmatmul.bf16.vlgmr.msrb.gmra.mxu2 %v683_v33  ;;  %v416_v42 = vmax.f32 %v414_v28, %v415_v36  ;;  %v635_v43 = vsel %vm579_vm0, %v226_v34, %v178_v25 }
  0x81   :  { %v322_v41 = vmax.f32 %v320_v27, %v321_v35  ;;  %v369_v44 = vrot.slane %v368_v38, 1  ;;  %v510_v46 = vmax.f32 %v130_v24, %v509_v40  ;;  %v636_v47 = vsel %vm581_vm1, %v274_v37, %v635_v43 }
  0x82   :  { %v463_v45 = vrot.slane %v462_v39, 2  ;;  %v417_v48 = vrot.slane %v416_v42, 1 }
  0x83   :  { %v637_v49 = vsel %vm583_vm2, %v322_v41, %v636_v47  ;;  %v370_v50 = vmax.f32 %v368_v38, %v369_v44  ;;  %v511_v52 = vrot.slane %v510_v46, 2 }
  0x84   :  { %v464_v51 = vmax.f32 %v462_v39, %v463_v45  ;;  %v418_v53 = vmax.f32 %v416_v42, %v417_v48 }
  0x85   :  { %v512_v55 = vmax.f32 %v510_v46, %v511_v52  ;;  %v638_v56 = vsel %vm585_vm3, %v370_v50, %v637_v49 }
  0x86   :  { %v465_v54 = vrot.slane %v464_v51, 1  ;;  %v639_v57 = vsel %vm587_vm4, %v418_v53, %v638_v56 }
  0x87   :  { %v513_v59 = vrot.slane %v512_v55, 1 }
  0x88   :  { %v466_v58 = vmax.f32 %v464_v51, %v465_v54 }
  0x89   :  { %v514_v60 = vmax.f32 %v512_v55, %v513_v59 }
  0x8a   :  { %v640_v61 = vsel %vm589_vm5, %v466_v58, %v639_v57 }
  0x8b   :  { %v641_v62 = vsel %vm591_vm6, %v514_v60, %v640_v61 }
  0x8c   :  { %v684_v63 = vpack.c.bf16 %v641_v62, %v641_v62 }
  0x8e   :  { %1300 = vmatmul.bf16.vlgmr.msrb.gmra.mxu3 %v684_v63 }
  0xb2   :  { %v1236_v0 = vpop.f32.mrf.mxu2 }
  0xba   :  { %v1238_v2 = vpop.f32.mrf.mxu2 }
  0xbd   :  { %v1249_v1 = vpop.f32.mrf.mxu3 }
  0xc5   :  { %v1251_v3 = vpop.f32.mrf.mxu3  ;;  %v1210_v4 = vpop.f32.mrf.mxu0 }
  0xc6   :  { %v1211_v7 = vadd.f32 %v1650_v5, %v1210_v4 }
  0xcd   :  { %v1212_v6 = vpop.f32.mrf.mxu0 }
  0xd3   :  { %v1223_v8 = vpop.f32.mrf.mxu1 }
  0xd4   :  { %v1224_v9 = vadd.f32 %v1223_v8, %v1211_v7 }
  0xd6   :  { %v1237_v10 = vadd.f32 %v1236_v0, %v1224_v9 }
  0xd8   :  { %v1250_v11 = vadd.f32 %v1249_v1, %v1237_v10 }
  0xdb   :  { %v1225_v12 = vpop.f32.mrf.mxu1 }
  0xe1   :  { %v1262_v13 = vpop.f32.mrf.mxu0 }
  0xe2   :  { %v1263_v18 = vadd.f32 %v1262_v13, %v1250_v11 }
  0xe9   :  { %v1264_v14 = vpop.f32.mrf.mxu0 }
  0xef   :  { %v1275_v15 = vpop.f32.mrf.mxu1 }
  0xf0   :  { %v1276_v20 = vadd.f32 %v1275_v15, %v1263_v18 }
  0xf7   :  { %v1277_v16 = vpop.f32.mrf.mxu1 }
 0x103   :  { %v1288_v17 = vpop.f32.mrf.mxu2 }
 0x104   :  { %v1289_v21 = vadd.f32 %v1288_v17, %v1276_v20 }
 0x10b   :  { %v1290_v19 = vpop.f32.mrf.mxu2 }
 0x111   :  { %v1301_v22 = vpop.f32.mrf.mxu3 }
 0x112   :  { %v1302_v23 = vadd.f32 %v1301_v22, %v1289_v21 }
 0x114   :  { %1305 = vst [vmem:[#allocation8] sm:$0xff] %v1302_v23 }
 0x115   :  { %1316 = dma.vmem_to_hbm [thread:$0]  %s1312_s26, 128, %s1314_s28, [#allocation5]  }
 0x119   :  { %v1303_v24 = vpop.f32.mrf.mxu3 }
 0x11a   :  { %1727 = dma.done.wait [#allocation5], 128  }
 0x11b   :  { %1728 = vsyncadd [#allocation5], 4294967168 }
 0x11c   :  { %1321 = vsyncpa [#allocation4], 1 }
 0x11d   :  { %1322 = vsyncpa [#allocation7], 1 }
 0x11e   :  { %1323 = vsyncpa [#allocation5], 1 }

</bundles_post_ra>
